<compile_context>
chip_gen: v7x
topology: tpu7x:2x2x1
jax: 0.10.0
libtpu: 0.0.40
codegen_flags: <defaults>
</compile_context>

<pallas_src>
import functools

import jax
import jax.numpy as jnp
import numpy as np
from jax.experimental import pallas as pl
from jax.experimental.pallas import tpu as pltpu

INPUT_DIM = 100
HIDDEN = 256
OUT_DIM = 784


def _round_up(x, m):
    return (x + m - 1) // m * m


def _choose_tiling(batch, tile_m):
    """Pick (tile, b_pad): tile is a multiple of 8 that divides b_pad."""
    tile_m = max(8, _round_up(int(tile_m), 8))
    b_pad = _round_up(batch, 8)
    tile = min(tile_m, b_pad)
    while b_pad % tile != 0:          # both are multiples of 8 -> terminates at >= 8
        tile -= 8
    # Prefer >= 2 grid steps so both v7x TensorCores get work (harmless elsewhere).
    if b_pad // tile == 1 and b_pad >= 16 and (b_pad // 2) % 8 == 0:
        tile = b_pad // 2
    return tile, b_pad


def generator_kernel(x_ref, w1_ref, b1_ref, w2_ref, b2_ref, w3_ref, b3_ref, o_ref):
    """Fused 3-layer MLP on one batch tile (bf16 MXU matmuls, f32 accumulate)."""
    x = x_ref[...].astype(jnp.bfloat16)

    # Linear(100 -> 256) + ReLU   (unaligned K=100; Mosaic pads the contraction)
    h1 = jnp.dot(x, w1_ref[...], preferred_element_type=jnp.float32) + b1_ref[...]
    h1 = jnp.maximum(h1, 0.0).astype(jnp.bfloat16)

    # Linear(256 -> 256) + ReLU
    h2 = jnp.dot(h1, w2_ref[...], preferred_element_type=jnp.float32) + b2_ref[...]
    h2 = jnp.maximum(h2, 0.0).astype(jnp.bfloat16)

    # Linear(256 -> 784) + Tanh   (tanh in f32: safe on v5e's non-bf16 EUP)
    h3 = jnp.dot(h2, w3_ref[...], preferred_element_type=jnp.float32) + b3_ref[...]
    o_ref[...] = jnp.tanh(h3).astype(o_ref.dtype)


@functools.partial(jax.jit, static_argnames=("tile_m", "out_dtype"))
def generator_forward(x, w1, b1, w2, b2, w3, b3, *, tile_m=512,
                      out_dtype=jnp.float32):
    """Forward pass.  x: (B, 100) f32.  Weights bf16 in (in, out) layout, biases f32 (1, out)."""
    B, D = x.shape
    assert D == INPUT_DIM

    tile, b_pad = _choose_tiling(B, tile_m)

    # Only ragged batches need a (tiny, 100-wide) row-padding copy of the input.
    if b_pad != B:
        x = jnp.concatenate(
            [x, jnp.zeros((b_pad - B, INPUT_DIM), x.dtype)], axis=0)

    grid = (b_pad // tile,)

    # Advisory cost estimate for XLA's scheduler.
    flops = 2 * b_pad * (INPUT_DIM * HIDDEN + HIDDEN * HIDDEN + HIDDEN * OUT_DIM)
    bytes_accessed = (
        b_pad * INPUT_DIM * x.dtype.itemsize
        + (INPUT_DIM * HIDDEN + HIDDEN * HIDDEN + HIDDEN * OUT_DIM) * w1.dtype.itemsize
        + (HIDDEN + HIDDEN + OUT_DIM) * 4
        + b_pad * OUT_DIM * jnp.dtype(out_dtype).itemsize
    )

    # Weights / biases: constant index_map -> VMEM-resident across all grid steps.
    # Blocks whose last dims equal the full array dims (100, 784, 1-row biases)
    # are legal even though not (8,128)-divisible.
    in_specs = [
        pl.BlockSpec((tile, INPUT_DIM), lambda i: (i, 0)),     # x tile (native 100)
        pl.BlockSpec((INPUT_DIM, HIDDEN), lambda i: (0, 0)),   # W1 (bf16)
        pl.BlockSpec((1, HIDDEN), lambda i: (0, 0)),           # b1 (f32)
        pl.BlockSpec((HIDDEN, HIDDEN), lambda i: (0, 0)),      # W2 (bf16)
        pl.BlockSpec((1, HIDDEN), lambda i: (0, 0)),           # b2 (f32)
        pl.BlockSpec((HIDDEN, OUT_DIM), lambda i: (0, 0)),     # W3 (bf16, native 784)
        pl.BlockSpec((1, OUT_DIM), lambda i: (0, 0)),          # b3 (f32, native 784)
    ]
    out_specs = pl.BlockSpec((tile, OUT_DIM), lambda i: (i, 0))

    out = pl.pallas_call(
        generator_kernel,
        out_shape=jax.ShapeDtypeStruct((b_pad, OUT_DIM), out_dtype),
        grid_spec=pltpu.PrefetchScalarGridSpec(
            num_scalar_prefetch=0,
            grid=grid,
            in_specs=in_specs,
            out_specs=out_specs,
        ),
        compiler_params=pltpu.CompilerParams(
            dimension_semantics=("parallel",),   # batch steps are independent (megacore)
        ),
        cost_estimate=pl.CostEstimate(
            flops=flops,
            transcendentals=b_pad * OUT_DIM,     # tanh
            bytes_accessed=bytes_accessed,
        ),
    )(x, w1, b1, w2, b2, w3, b3)

    # For multiple-of-tile batches this is a no-op; only ragged batches pay a slice.
    return out if b_pad == B else out[:B]


def init_params(key):
    """Deterministic parameter init (PyTorch-Linear-like uniform fan-in init), f32 (in, out)."""
    ks = jax.random.split(key, 6)

    def linear_init(kw, kb, fan_in, fan_out):
        bound = 1.0 / np.sqrt(fan_in)
        w = jax.random.uniform(kw, (fan_in, fan_out), jnp.float32, -bound, bound)
        b = jax.random.uniform(kb, (1, fan_out), jnp.float32, -bound, bound)
        return w, b

    w1, b1 = linear_init(ks[0], ks[1], INPUT_DIM, HIDDEN)
    w2, b2 = linear_init(ks[2], ks[3], HIDDEN, HIDDEN)
    w3, b3 = linear_init(ks[4], ks[5], HIDDEN, OUT_DIM)
    return w1, b1, w2, b2, w3, b3


def prepare_params(w1, b1, w2, b2, w3, b3):
    """One-time layout/dtype prep: weights -> bf16 (in, out); biases -> f32 (1, out)."""
    to_w = lambda w: jnp.asarray(w, jnp.bfloat16)
    to_b = lambda b: jnp.asarray(b, jnp.float32).reshape(1, -1)
    return to_w(w1), to_b(b1), to_w(w2), to_b(b2), to_w(w3), to_b(b3)


def reference_forward(x, w1, b1, w2, b2, w3, b3):
    h = jnp.maximum(x @ w1 + b1, 0.0)
    h = jnp.maximum(h @ w2 + b2, 0.0)
    return jnp.tanh(h @ w3 + b3)


if __name__ == "__main__":
    key = jax.random.PRNGKey(0)
    k_x, k_p = jax.random.split(key)
    params_f32 = init_params(k_p)
    params = prepare_params(*params_f32)   # done once, outside the jitted forward

    # Case 1: small batch of latent vectors (batch=2), single grid step.
    batch = 2
    x = jax.random.normal(k_x, (batch, INPUT_DIM), dtype=jnp.float32)
    out = jax.block_until_ready(generator_forward(x, *params))
    ref = reference_forward(x, *params_f32)
    np.testing.assert_allclose(np.asarray(out), np.asarray(ref), rtol=2e-2, atol=2e-2)
    assert out.shape == (batch, OUT_DIM)

    # Case 2: multiple-of-tile batch -> multi-step grid, no padding / no output copy.
    batch2 = 64
    x2 = jax.random.normal(k_x, (batch2, INPUT_DIM), dtype=jnp.float32)
    out2 = jax.block_until_ready(generator_forward(x2, *params, tile_m=16))
    ref2 = reference_forward(x2, *params_f32)
    np.testing.assert_allclose(np.asarray(out2), np.asarray(ref2), rtol=2e-2, atol=2e-2)
    assert out2.shape == (batch2, OUT_DIM)

    # Case 3: ragged batch (row padding + trailing slice path).
    batch3 = 37
    x3 = jax.random.normal(k_x, (batch3, INPUT_DIM), dtype=jnp.float32)
    out3 = jax.block_until_ready(generator_forward(x3, *params, tile_m=16))
    ref3 = reference_forward(x3, *params_f32)
    np.testing.assert_allclose(np.asarray(out3), np.asarray(ref3), rtol=2e-2, atol=2e-2)
    assert out3.shape == (batch3, OUT_DIM)

    print("KERNEL_OK")
</pallas_src>

<mosaic_0001>
module attributes {stable_mosaic.version = 11 : i64} {
  func.func @generator_kernel(%arg0: i32, %arg1: memref<8x100xf32, #tpu.memory_space<vmem>>, %arg2: memref<100x256xbf16, #tpu.memory_space<vmem>>, %arg3: memref<1x256xf32, #tpu.memory_space<vmem>>, %arg4: memref<256x256xbf16, #tpu.memory_space<vmem>>, %arg5: memref<1x256xf32, #tpu.memory_space<vmem>>, %arg6: memref<256x784xbf16, #tpu.memory_space<vmem>>, %arg7: memref<1x784xf32, #tpu.memory_space<vmem>>, %arg8: memref<8x784xf32, #tpu.memory_space<vmem>>) attributes {dimension_semantics = [#tpu.dimension_semantics<parallel>], iteration_bounds = array<i64: 1>, scalar_prefetch = 0 : i64, scratch_operands = 0 : i64, tpu.core_type = #tpu.core_type<tc>, window_params = [{transform_indices = @transform_0, window_bounds = array<i64: 8, 100>}, {pipeline_mode = #tpu.pipeline_mode<synchronous>, transform_indices = @transform_1, window_bounds = array<i64: 100, 256>}, {pipeline_mode = #tpu.pipeline_mode<synchronous>, transform_indices = @transform_2, window_bounds = array<i64: 1, 256>}, {pipeline_mode = #tpu.pipeline_mode<synchronous>, transform_indices = @transform_3, window_bounds = array<i64: 256, 256>}, {pipeline_mode = #tpu.pipeline_mode<synchronous>, transform_indices = @transform_4, window_bounds = array<i64: 1, 256>}, {pipeline_mode = #tpu.pipeline_mode<synchronous>, transform_indices = @transform_5, window_bounds = array<i64: 256, 784>}, {pipeline_mode = #tpu.pipeline_mode<synchronous>, transform_indices = @transform_6, window_bounds = array<i64: 1, 784>}, {transform_indices = @transform_7, window_bounds = array<i64: 8, 784>}]} {
    %c0 = arith.constant 0 : index
    %c0_0 = arith.constant 0 : index
    %0 = vector.load %arg1[%c0, %c0_0] : memref<8x100xf32, #tpu.memory_space<vmem>>, vector<8x100xf32>
    %1 = arith.truncf %0 : vector<8x100xf32> to vector<8x100xbf16>
    %c0_1 = arith.constant 0 : index
    %c0_2 = arith.constant 0 : index
    %2 = vector.load %arg2[%c0_1, %c0_2] : memref<100x256xbf16, #tpu.memory_space<vmem>>, vector<100x256xbf16>
    %cst = arith.constant dense<0.000000e+00> : vector<8x256xf32>
    %3 = tpu.matmul %1, %2, %cst {dimension_numbers = #tpu.dot_dimension_numbers<[1], [0], [0], [1], [0, 0, 1, 1], [], []>} : vector<8x100xbf16>, vector<100x256xbf16>, vector<8x256xf32> -> vector<8x256xf32>
    %c0_3 = arith.constant 0 : index
    %c0_4 = arith.constant 0 : index
    %4 = vector.load %arg3[%c0_3, %c0_4] : memref<1x256xf32, #tpu.memory_space<vmem>>, vector<1x256xf32>
    %5 = vector.broadcast %4 : vector<1x256xf32> to vector<8x256xf32>
    %6 = arith.addf %3, %5 : vector<8x256xf32>
    %cst_5 = arith.constant 0.000000e+00 : f32
    %7 = vector.broadcast %cst_5 : f32 to vector<8x256xf32>
    %8 = arith.maximumf %6, %7 : vector<8x256xf32>
    %9 = arith.truncf %8 : vector<8x256xf32> to vector<8x256xbf16>
    %c0_6 = arith.constant 0 : index
    %c0_7 = arith.constant 0 : index
    %10 = vector.load %arg4[%c0_6, %c0_7] : memref<256x256xbf16, #tpu.memory_space<vmem>>, vector<256x256xbf16>
    %cst_8 = arith.constant dense<0.000000e+00> : vector<8x256xf32>
    %11 = tpu.matmul %9, %10, %cst_8 {dimension_numbers = #tpu.dot_dimension_numbers<[1], [0], [0], [1], [0, 0, 1, 1], [], []>} : vector<8x256xbf16>, vector<256x256xbf16>, vector<8x256xf32> -> vector<8x256xf32>
    %c0_9 = arith.constant 0 : index
    %c0_10 = arith.constant 0 : index
    %12 = vector.load %arg5[%c0_9, %c0_10] : memref<1x256xf32, #tpu.memory_space<vmem>>, vector<1x256xf32>
    %13 = vector.broadcast %12 : vector<1x256xf32> to vector<8x256xf32>
    %14 = arith.addf %11, %13 : vector<8x256xf32>
    %cst_11 = arith.constant 0.000000e+00 : f32
    %15 = vector.broadcast %cst_11 : f32 to vector<8x256xf32>
    %16 = arith.maximumf %14, %15 : vector<8x256xf32>
    %17 = arith.truncf %16 : vector<8x256xf32> to vector<8x256xbf16>
    %c0_12 = arith.constant 0 : index
    %c0_13 = arith.constant 0 : index
    %18 = vector.load %arg6[%c0_12, %c0_13] : memref<256x784xbf16, #tpu.memory_space<vmem>>, vector<256x784xbf16>
    %cst_14 = arith.constant dense<0.000000e+00> : vector<8x784xf32>
    %19 = tpu.matmul %17, %18, %cst_14 {dimension_numbers = #tpu.dot_dimension_numbers<[1], [0], [0], [1], [0, 0, 1, 1], [], []>} : vector<8x256xbf16>, vector<256x784xbf16>, vector<8x784xf32> -> vector<8x784xf32>
    %c0_15 = arith.constant 0 : index
    %c0_16 = arith.constant 0 : index
    %20 = vector.load %arg7[%c0_15, %c0_16] : memref<1x784xf32, #tpu.memory_space<vmem>>, vector<1x784xf32>
    %21 = vector.broadcast %20 : vector<1x784xf32> to vector<8x784xf32>
    %22 = arith.addf %19, %21 : vector<8x784xf32>
    %23 = math.tanh %22 : vector<8x784xf32>
    %c0_17 = arith.constant 0 : index
    %c0_18 = arith.constant 0 : index
    %24 = vector.load %arg8[%c0_17, %c0_18] : memref<8x784xf32, #tpu.memory_space<vmem>>, vector<8x784xf32>
    tpu.vector_store %arg8[%c0_17, %c0_18], %23 {strides = array<i32>} : memref<8x784xf32, #tpu.memory_space<vmem>>, vector<8x784xf32>,
    return
  }
  func.func @transform_0(%arg0: i32) -> (i32, i32) {
    %c0_i32 = arith.constant 0 : i32
    %c0_i32_0 = arith.constant 0 : i32
    return %arg0, %c0_i32 : i32, i32
  }
  func.func @transform_1(%arg0: i32) -> (i32, i32) {
    %c0_i32 = arith.constant 0 : i32
    %c0_i32_0 = arith.constant 0 : i32
    %c0_i32_1 = arith.constant 0 : i32
    return %c0_i32, %c0_i32_0 : i32, i32
  }
  func.func @transform_2(%arg0: i32) -> (i32, i32) {
    %c0_i32 = arith.constant 0 : i32
    %c0_i32_0 = arith.constant 0 : i32
    %c0_i32_1 = arith.constant 0 : i32
    return %c0_i32, %c0_i32_0 : i32, i32
  }
  func.func @transform_3(%arg0: i32) -> (i32, i32) {
    %c0_i32 = arith.constant 0 : i32
    %c0_i32_0 = arith.constant 0 : i32
    %c0_i32_1 = arith.constant 0 : i32
    return %c0_i32, %c0_i32_0 : i32, i32
  }
  func.func @transform_4(%arg0: i32) -> (i32, i32) {
    %c0_i32 = arith.constant 0 : i32
    %c0_i32_0 = arith.constant 0 : i32
    %c0_i32_1 = arith.constant 0 : i32
    return %c0_i32, %c0_i32_0 : i32, i32
  }
  func.func @transform_5(%arg0: i32) -> (i32, i32) {
    %c0_i32 = arith.constant 0 : i32
    %c0_i32_0 = arith.constant 0 : i32
    %c0_i32_1 = arith.constant 0 : i32
    return %c0_i32, %c0_i32_0 : i32, i32
  }
  func.func @transform_6(%arg0: i32) -> (i32, i32) {
    %c0_i32 = arith.constant 0 : i32
    %c0_i32_0 = arith.constant 0 : i32
    %c0_i32_1 = arith.constant 0 : i32
    return %c0_i32, %c0_i32_0 : i32, i32
  }
  func.func @transform_7(%arg0: i32) -> (i32, i32) {
    %c0_i32 = arith.constant 0 : i32
    %c0_i32_0 = arith.constant 0 : i32
    return %arg0, %c0_i32 : i32, i32
  }
}

</mosaic_0001>

<bundles_post_ra>
// kernel: generator_forward.1
= control target key start
LH: loop header
LB: loop body
LE: loop exit
PB: predicated region body
PF: predicated region fallthrough
CT: control target
= control target key end

     0   :  { %v1772_v1 = vmov 0   ;;  %vm123_vm0 = vcmask 1041408   ;;  %vm119_vm1 = vcmask 818176   ;;  %vm1341_vm2 = vcmask 130048   ;;  %s2342_s1 = inlined_call_operand.vmem [shape: bf16[100,256], index: 1, kind: input, shape index: {}]   ;;  %s2343_s3 = inlined_call_operand.vmem [shape: bf16[256,256], index: 3, kind: input, shape index: {}]   ;;  %s2344_s0 = inlined_call_operand.vmem [shape: f32[8,100], index: 0, kind: input, shape index: {}]   ;;  %s2345_s5 = inlined_call_operand.vmem [shape: bf16[256,784], index: 5, kind: input, shape index: {}]   ;;  %s2346_s2 = inlined_call_operand.vmem [shape: f32[1,256], index: 2, kind: input, shape index: {}]   ;;  %s2347_s4 = inlined_call_operand.vmem [shape: f32[1,256], index: 4, kind: input, shape index: {}]   ;;  %s2348_s6 = inlined_call_operand.vmem [shape: f32[1,784], index: 6, kind: input, shape index: {}]   ;;  %s2349_s7 = inlined_call_operand.vmem [shape: f32[8,784], index: 7, kind: output, shape index: {}]  }
   0x1   :  { %v1530_v0 = vld [vmem:[%s2342_s1 + $0x4] ss:$8 sps:$4 sm:$0xff]   ;;  %162 = vmatprep.mubr.bf16.mxu0 %v1772_v1  ;;  %v1532_v2 = vld [vmem:[%s2342_s1] ss:$8 sps:$4 sm:$0xff]   ;;  %v1533_v3 = vld [vmem:[%s2342_s1 + $0x14] ss:$8 sps:$4 sm:$0xff]  }
   0x2   :  { %130 = vmatprep.subr.bf16.mxu0 %v1530_v0  ;;  %v1535_v4 = vld [vmem:[%s2342_s1 + $0x10] ss:$8 sps:$4 sm:$0xff]   ;;  %v1536_v5 = vld [vmem:[%s2342_s1 + $0x24] ss:$8 sps:$4 sm:$0xff]   ;;  %v1538_v6 = vld [vmem:[%s2342_s1 + $0x20] ss:$8 sps:$4 sm:$0xff]  }
   0x3   :  { %131 = vmatpush1.bf16.msra.mxu0 %v1532_v2  ;;  %v1539_v7 = vld [vmem:[%s2342_s1 + $0x34] ss:$8 sps:$4 sm:$0xff]   ;;  %v1550_v8 = vld [vmem:[%s2343_s3 + $0x4] ss:$8 sps:$4 sm:$0xff]   ;;  %v1552_v9 = vld [vmem:[%s2343_s3] ss:$8 sps:$4 sm:$0xff]  }
   0x4   :  { %132 = vmatprep.subr.bf16.mxu0 %v1533_v3  ;;  %v1553_v10 = vld [vmem:[%s2343_s3 + $0x14] ss:$8 sps:$4 sm:$0xff]   ;;  %v1541_v11 = vld [vmem:[%s2342_s1 + $0x30] ss:$8 sps:$4 sm:$0xff]   ;;  %379 = vmatprep.subr.bf16.mxu1 %v1550_v8  ;;  %v1542_v12 = vld [vmem:[%s2342_s1 + $0x44] ss:$8 sps:$4 sm:$0xff]  }
   0x5   :  { %380 = vmatpush1.bf16.msra.mxu1 %v1552_v9  ;;  %v1555_v13 = vld [vmem:[%s2343_s3 + $0x10] ss:$8 sps:$4 sm:$0xff]   ;;  %v1556_v14 = vld [vmem:[%s2343_s3 + $0x24] ss:$8 sps:$4 sm:$0xff]   ;;  %v1544_v15 = vld [vmem:[%s2342_s1 + $0x40] ss:$8 sps:$4 sm:$0xff]  }
   0x6   :  { %381 = vmatprep.subr.bf16.mxu1 %v1553_v10  ;;  %v1545_v16 = vld [vmem:[%s2342_s1 + $0x54] ss:$8 sps:$4 sm:$0xff]   ;;  %v1558_v17 = vld [vmem:[%s2343_s3 + $0x20] ss:$8 sps:$4 sm:$0xff]   ;;  %v1547_v20 = vld [vmem:[%s2342_s1 + $0x50] ss:$8 sps:$4 sm:$0xff]  }
   0x7   :  { %133 = vmatpush1.bf16.msra.mxu0 %v1535_v4  ;;  %v41_v18 = vld [vmem:[%s2342_s1 + $0x60] sm:$0x33]  ;;  %v1559_v19 = vld [vmem:[%s2343_s3 + $0x34] ss:$8 sps:$4 sm:$0xff]   ;;  %v1561_v23 = vld [vmem:[%s2343_s3 + $0x30] ss:$8 sps:$4 sm:$0xff]  }
   0x8   :  { %134 = vmatprep.subr.bf16.mxu0 %v1536_v5  ;;  %v1360_v21 = vcombine.high %v41_v18, %v41_v18  ;;  %v1359_v22 = vcombine.low %v41_v18, %v41_v18  ;;  %v1562_v24 = vld [vmem:[%s2343_s3 + $0x44] ss:$8 sps:$4 sm:$0xff]   ;;  %v1564_v27 = vld [vmem:[%s2343_s3 + $0x40] ss:$8 sps:$4 sm:$0xff]   ;;  %v1565_v28 = vld [vmem:[%s2343_s3 + $0x54] ss:$8 sps:$4 sm:$0xff]  }
   0x9   :  { %382 = vmatpush1.bf16.msra.mxu1 %v1555_v13  ;;  %v27_v25 = vld [vmem:[%s2344_s0] sm:$0xff]  ;;  %v1567_v30 = vld [vmem:[%s2343_s3 + $0x50] ss:$8 sps:$4 sm:$0xff]   ;;  %v1571_v33 = vld [vmem:[%s2343_s3 + $0x74] ss:$8 sps:$4 sm:$0xff]  }
   0xa   :  { %383 = vmatprep.subr.bf16.mxu1 %v1556_v14  ;;  %v125_v26 = vsel %vm123_vm0, %v1359_v22, 0  ;;  %v28_v29 = vpack.c.bf16 %v27_v25, %v27_v25  ;;  %v1568_v31 = vld [vmem:[%s2343_s3 + $0x64] ss:$8 sps:$4 sm:$0xff]   ;;  %v1570_v32 = vld [vmem:[%s2343_s3 + $0x60] ss:$8 sps:$4 sm:$0xff]  }
   0xb   :  { %135 = vmatpush1.bf16.msra.mxu0 %v1538_v6  ;;  %v1573_v34 = vld [vmem:[%s2343_s3 + $0x70] ss:$8 sps:$4 sm:$0xff]   ;;  %v1574_v35 = vld [vmem:[%s2343_s3 + $0x84] ss:$8 sps:$4 sm:$0xff]   ;;  %v1576_v36 = vld [vmem:[%s2343_s3 + $0x80] ss:$8 sps:$4 sm:$0xff]  }
   0xc   :  { %136 = vmatprep.subr.bf16.mxu0 %v1539_v7  ;;  %v1577_v37 = vld [vmem:[%s2343_s3 + $0x94] ss:$8 sps:$4 sm:$0xff]   ;;  %v1579_v38 = vld [vmem:[%s2343_s3 + $0x90] ss:$8 sps:$4 sm:$0xff]   ;;  %v1580_v39 = vld [vmem:[%s2343_s3 + $0xa4] ss:$8 sps:$4 sm:$0xff]  }
   0xd   :  { %384 = vmatpush1.bf16.msra.mxu1 %v1558_v17  ;;  %v1582_v40 = vld [vmem:[%s2343_s3 + $0xa0] ss:$8 sps:$4 sm:$0xff]   ;;  %v1583_v41 = vld [vmem:[%s2343_s3 + $0xb4] ss:$8 sps:$4 sm:$0xff]   ;;  %v1585_v42 = vld [vmem:[%s2343_s3 + $0xb0] ss:$8 sps:$4 sm:$0xff]  }
   0xe   :  { %385 = vmatprep.subr.bf16.mxu1 %v1559_v19  ;;  %v1586_v43 = vld [vmem:[%s2343_s3 + $0xc4] ss:$8 sps:$4 sm:$0xff]   ;;  %v1588_v44 = vld [vmem:[%s2343_s3 + $0xc0] ss:$8 sps:$4 sm:$0xff]   ;;  %v1589_v45 = vld [vmem:[%s2343_s3 + $0xd4] ss:$8 sps:$4 sm:$0xff]  }
   0xf   :  { %137 = vmatpush1.bf16.msra.mxu0 %v1541_v11  ;;  %v1591_v46 = vld [vmem:[%s2343_s3 + $0xd0] ss:$8 sps:$4 sm:$0xff]   ;;  %v1592_v47 = vld [vmem:[%s2343_s3 + $0xe4] ss:$8 sps:$4 sm:$0xff]   ;;  %v1594_v48 = vld [vmem:[%s2343_s3 + $0xe0] ss:$8 sps:$4 sm:$0xff]  }
  0x10   :  { %138 = vmatprep.subr.bf16.mxu0 %v1542_v12  ;;  %v1595_v49 = vld [vmem:[%s2343_s3 + $0xf4] ss:$8 sps:$4 sm:$0xff]   ;;  %v1597_v50 = vld [vmem:[%s2343_s3 + $0xf0] ss:$8 sps:$4 sm:$0xff]   ;;  %v1600_v52 = vld [vmem:[%s2345_s5 + $0x4] ss:$28 sps:$4 sm:$0xff]  }
  0x11   :  { %386 = vmatpush1.bf16.msra.mxu1 %v1561_v23  ;;  %v1598_v51 = vld [vmem:[%s2345_s5] ss:$28 sps:$4 sm:$0xff]   ;;  %v1603_v53 = vld [vmem:[%s2345_s5 + $0xc] ss:$28 sps:$4 sm:$0xff]   ;;  %v1604_v55 = vld [vmem:[%s2345_s5 + $0x38] ss:$28 sps:$4 sm:$0xff]  }
  0x12   :  { %387 = vmatprep.subr.bf16.mxu1 %v1562_v24  ;;  %v1606_v54 = vld [vmem:[%s2345_s5 + $0x3c] ss:$28 sps:$4 sm:$0xff]   ;;  %v1612_v56 = vld [vmem:[%s2345_s5 + $0x74] ss:$28 sps:$4 sm:$0xff]   ;;  %v1618_v58 = vld [vmem:[%s2345_s5 + $0xac] ss:$28 sps:$4 sm:$0xff]  }
  0x13   :  { %139 = vmatpush1.bf16.msra.mxu0 %v1544_v15  ;;  %v1610_v57 = vld [vmem:[%s2345_s5 + $0x70] ss:$28 sps:$4 sm:$0xff]   ;;  %v1616_v59 = vld [vmem:[%s2345_s5 + $0xa8] ss:$28 sps:$4 sm:$0xff]   ;;  %v1622_v61 = vld [vmem:[%s2345_s5 + $0xe0] ss:$28 sps:$4 sm:$0xff]  }
  0x14   :  { %140 = vmatprep.subr.bf16.mxu0 %v1545_v16  ;;  %v1624_v60 = vld [vmem:[%s2345_s5 + $0xe4] ss:$28 sps:$4 sm:$0xff]   ;;  %v1630_v62 = vld [vmem:[%s2345_s5 + $0x11c] ss:$28 sps:$4 sm:$0xff]   ;;  %v1636_v0 = vld [vmem:[%s2345_s5 + $0x154] ss:$28 sps:$4 sm:$0xff]   ;;  %v44_v16 = vlaneseq }
  0x15   :  { %388 = vmatpush1.bf16.msra.mxu1 %v1564_v27  ;;  %v1628_v63 = vld [vmem:[%s2345_s5 + $0x118] ss:$28 sps:$4 sm:$0xff]   ;;  %v1634_v1 = vld [vmem:[%s2345_s5 + $0x150] ss:$28 sps:$4 sm:$0xff]   ;;  %v1640_v3 = vld [vmem:[%s2345_s5 + $0x188] ss:$28 sps:$4 sm:$0xff]  }
  0x16   :  { %389 = vmatprep.subr.bf16.mxu1 %v1565_v28  ;;  %v1642_v2 = vld [vmem:[%s2345_s5 + $0x18c] ss:$28 sps:$4 sm:$0xff]   ;;  %v1648_v4 = vld [vmem:[%s2345_s5 + $0x1c4] ss:$28 sps:$4 sm:$0xff]   ;;  %v1654_v6 = vld [vmem:[%s2345_s5 + $0x1fc] ss:$28 sps:$4 sm:$0xff]  }
  0x17   :  { %141 = vmatpush1.bf16.msra.mxu0 %v1547_v20  ;;  %v1646_v5 = vld [vmem:[%s2345_s5 + $0x1c0] ss:$28 sps:$4 sm:$0xff]   ;;  %v1652_v7 = vld [vmem:[%s2345_s5 + $0x1f8] ss:$28 sps:$4 sm:$0xff]   ;;  %v1658_v9 = vld [vmem:[%s2345_s5 + $0x230] ss:$28 sps:$4 sm:$0xff]  }
  0x18   :  { %1361 = vmatprep.subr.msk.bf16.mxu0 %vm123_vm0, %v1360_v21  ;;  %v1660_v8 = vld [vmem:[%s2345_s5 + $0x234] ss:$28 sps:$4 sm:$0xff]   ;;  %v1666_v10 = vld [vmem:[%s2345_s5 + $0x26c] ss:$28 sps:$4 sm:$0xff]   ;;  %v1672_v12 = vld [vmem:[%s2345_s5 + $0x2a4] ss:$28 sps:$4 sm:$0xff]  }
  0x19   :  { %390 = vmatpush1.bf16.msra.mxu1 %v1567_v30  ;;  %v1664_v11 = vld [vmem:[%s2345_s5 + $0x268] ss:$28 sps:$4 sm:$0xff]   ;;  %v1670_v13 = vld [vmem:[%s2345_s5 + $0x2a0] ss:$28 sps:$4 sm:$0xff]   ;;  %v1676_v15 = vld [vmem:[%s2345_s5 + $0x2d8] ss:$28 sps:$4 sm:$0xff]  }
  0x1a   :  { %391 = vmatprep.subr.bf16.mxu1 %v1568_v31  ;;  %v1678_v14 = vld [vmem:[%s2345_s5 + $0x2dc] ss:$28 sps:$4 sm:$0xff]   ;;  %v2038_v17 = vshrl.u32 %v44_v16, 7  ;;  %v42_v19 = vld [vmem:[%s2346_s2] sm:$0x3] }
  0x1b   :  { %143 = vmatpush1.bf16.msra.mxu0 %v125_v26 }
  0x1c   :  { %1165 = vmatprep.subr.bf16.mxu0 %v1600_v52  ;;  %v2041_v18 = vsub.s32 0, %v2038_v17  ;;  %v2047_v20 = vsub.s32 1, %v2038_v17  ;;  %v1663_v52 = vld [vmem:[%s2345_s5 + $0x23c] ss:$28 sps:$4 sm:$0xff]  }
  0x1d   :  { %392 = vmatpush1.bf16.msra.mxu1 %v1570_v32  ;;  %v1601_v32 = vld [vmem:[%s2345_s5 + $0x8] ss:$28 sps:$4 sm:$0xff]  }
  0x1e   :  { %1362 = vmatmul.mubr.msk.bf16.vlgmr.msra.gmra.mrb[0].mxu0 %vm119_vm1, %v28_v29  ;;  %393 = vmatprep.subr.bf16.mxu1 %v1571_v33  ;;  %v47_v21 = vrot.slane %v42_v19, %v2041_v18  ;;  %v51_v22 = vrot.slane %v42_v19, %v2047_v20 }
  0x1f   :  { %1166 = vmatpush1.bf16.msra.mxu0 %v1598_v51  ;;  %v1655_v51 = vld [vmem:[%s2345_s5 + $0x200] ss:$28 sps:$4 sm:$0xff]  }
  0x20   :  { %1167 = vmatprep.subr.bf16.mxu0 %v1606_v54  ;;  %v1669_v54 = vld [vmem:[%s2345_s5 + $0x274] ss:$28 sps:$4 sm:$0xff]  }
  0x21   :  { %394 = vmatpush1.bf16.msra.mxu1 %v1573_v34  ;;  %v1609_v34 = vld [vmem:[%s2345_s5 + $0x44] ss:$28 sps:$4 sm:$0xff]  }
  0x22   :  { %395 = vmatprep.subr.bf16.mxu1 %v1574_v35  ;;  %v1607_v35 = vld [vmem:[%s2345_s5 + $0x40] ss:$28 sps:$4 sm:$0xff]  }
  0x23   :  { %1168 = vmatpush1.bf16.msra.mxu0 %v1604_v55  ;;  %v1667_v55 = vld [vmem:[%s2345_s5 + $0x270] ss:$28 sps:$4 sm:$0xff]  }
  0x24   :  { %1169 = vmatprep.subr.bf16.mxu0 %v1612_v56  ;;  %v1675_v56 = vld [vmem:[%s2345_s5 + $0x2ac] ss:$28 sps:$4 sm:$0xff]  }
  0x25   :  { %396 = vmatpush1.bf16.msra.mxu1 %v1576_v36  ;;  %v1615_v36 = vld [vmem:[%s2345_s5 + $0x7c] ss:$28 sps:$4 sm:$0xff]  }
  0x26   :  { %397 = vmatprep.subr.bf16.mxu1 %v1577_v37  ;;  %v1613_v37 = vld [vmem:[%s2345_s5 + $0x78] ss:$28 sps:$4 sm:$0xff]  }
  0x27   :  { %1170 = vmatpush1.bf16.msra.mxu0 %v1610_v57  ;;  %v1673_v57 = vld [vmem:[%s2345_s5 + $0x2a8] ss:$28 sps:$4 sm:$0xff]  }
  0x28   :  { %1171 = vmatprep.subr.bf16.mxu0 %v1618_v58  ;;  %v1681_v58 = vld [vmem:[%s2345_s5 + $0x2e4] ss:$28 sps:$4 sm:$0xff]  }
  0x29   :  { %398 = vmatpush1.bf16.msra.mxu1 %v1579_v38  ;;  %v1621_v38 = vld [vmem:[%s2345_s5 + $0xb4] ss:$28 sps:$4 sm:$0xff]  }
  0x2a   :  { %399 = vmatprep.subr.bf16.mxu1 %v1580_v39  ;;  %v1619_v39 = vld [vmem:[%s2345_s5 + $0xb0] ss:$28 sps:$4 sm:$0xff]  }
  0x2b   :  { %1172 = vmatpush1.bf16.msra.mxu0 %v1616_v59  ;;  %v1679_v59 = vld [vmem:[%s2345_s5 + $0x2e0] ss:$28 sps:$4 sm:$0xff]  }
  0x2c   :  { %1173 = vmatprep.subr.bf16.mxu0 %v1624_v60  ;;  %v1684_v60 = vld [vmem:[%s2345_s5 + $0x314] ss:$28 sps:$4 sm:$0xff]  }
  0x2d   :  { %400 = vmatpush1.bf16.msra.mxu1 %v1582_v40  ;;  %v1627_v40 = vld [vmem:[%s2345_s5 + $0xec] ss:$28 sps:$4 sm:$0xff]  }
  0x2e   :  { %401 = vmatprep.subr.bf16.mxu1 %v1583_v41  ;;  %v1625_v41 = vld [vmem:[%s2345_s5 + $0xe8] ss:$28 sps:$4 sm:$0xff]  }
  0x2f   :  { %1174 = vmatpush1.bf16.msra.mxu0 %v1622_v61  ;;  %v1687_v61 = vld [vmem:[%s2345_s5 + $0x31c] ss:$28 sps:$4 sm:$0xff]  }
  0x30   :  { %1175 = vmatprep.subr.bf16.mxu0 %v1630_v62  ;;  %v1682_v62 = vld [vmem:[%s2345_s5 + $0x310] ss:$28 sps:$4 sm:$0xff]  }
  0x31   :  { %402 = vmatpush1.bf16.msra.mxu1 %v1585_v42  ;;  %v1633_v42 = vld [vmem:[%s2345_s5 + $0x124] ss:$28 sps:$4 sm:$0xff]  }
  0x32   :  { %403 = vmatprep.subr.bf16.mxu1 %v1586_v43  ;;  %v1631_v43 = vld [vmem:[%s2345_s5 + $0x120] ss:$28 sps:$4 sm:$0xff]  }
  0x33   :  { %1176 = vmatpush1.bf16.msra.mxu0 %v1628_v63  ;;  %v1685_v63 = vld [vmem:[%s2345_s5 + $0x318] ss:$28 sps:$4 sm:$0xff]  }
  0x34   :  { %1177 = vmatprep.subr.bf16.mxu0 %v1636_v0  ;;  %v1690_v0 = vld [vmem:[%s2345_s5 + $0x34c] ss:$28 sps:$4 sm:$0xff]  }
  0x35   :  { %404 = vmatpush1.bf16.msra.mxu1 %v1588_v44  ;;  %v1639_v44 = vld [vmem:[%s2345_s5 + $0x15c] ss:$28 sps:$4 sm:$0xff]  }
  0x36   :  { %405 = vmatprep.subr.bf16.mxu1 %v1589_v45  ;;  %v1637_v45 = vld [vmem:[%s2345_s5 + $0x158] ss:$28 sps:$4 sm:$0xff]  }
  0x37   :  { %1178 = vmatpush1.bf16.msra.mxu0 %v1634_v1  ;;  %v1693_v1 = vld [vmem:[%s2345_s5 + $0x354] ss:$28 sps:$4 sm:$0xff]  }
  0x38   :  { %1179 = vmatprep.subr.bf16.mxu0 %v1642_v2  ;;  %v1688_v2 = vld [vmem:[%s2345_s5 + $0x348] ss:$28 sps:$4 sm:$0xff]  }
  0x39   :  { %406 = vmatpush1.bf16.msra.mxu1 %v1591_v46  ;;  %v1645_v46 = vld [vmem:[%s2345_s5 + $0x194] ss:$28 sps:$4 sm:$0xff]  }
  0x3a   :  { %407 = vmatprep.subr.bf16.mxu1 %v1592_v47  ;;  %v1643_v47 = vld [vmem:[%s2345_s5 + $0x190] ss:$28 sps:$4 sm:$0xff]  }
  0x3b   :  { %1180 = vmatpush1.bf16.msra.mxu0 %v1640_v3  ;;  %v1691_v3 = vld [vmem:[%s2345_s5 + $0x350] ss:$28 sps:$4 sm:$0xff]  }
  0x3c   :  { %1181 = vmatprep.subr.bf16.mxu0 %v1648_v4  ;;  %v1696_v4 = vld [vmem:[%s2345_s5 + $0x14] ss:$28 sps:$4 sm:$0xff]  }
  0x3d   :  { %408 = vmatpush1.bf16.msra.mxu1 %v1594_v48  ;;  %v1651_v48 = vld [vmem:[%s2345_s5 + $0x1cc] ss:$28 sps:$4 sm:$0xff]  }
  0x3e   :  { %409 = vmatprep.subr.bf16.mxu1 %v1595_v49  ;;  %v1649_v49 = vld [vmem:[%s2345_s5 + $0x1c8] ss:$28 sps:$4 sm:$0xff]  }
  0x3f   :  { %1182 = vmatpush1.bf16.msra.mxu0 %v1646_v5  ;;  %v1697_v5 = vld [vmem:[%s2345_s5 + $0x1d8] ss:$28 sps:$4 sm:$0xff]  }
  0x40   :  { %1183 = vmatprep.subr.bf16.mxu0 %v1654_v6  ;;  %v207_v6 = vld [vmem:[%s2347_s4] sm:$0x3] }
  0x41   :  { %410 = vmatpush1.bf16.msra.mxu1 %v1597_v50  ;;  %v1657_v50 = vld [vmem:[%s2345_s5 + $0x204] ss:$28 sps:$4 sm:$0xff]  }
  0x42   :  { %1206 = vmatprep.subr.bf16.mxu1 %v1603_v53  ;;  %v1661_v53 = vld [vmem:[%s2345_s5 + $0x238] ss:$28 sps:$4 sm:$0xff]  }
  0x43   :  { %1184 = vmatpush1.bf16.msra.mxu0 %v1652_v7  ;;  %v212_v7 = vrot.slane %v207_v6, %v2041_v18 }
  0x44   :  { %1185 = vmatprep.subr.bf16.mxu0 %v1660_v8  ;;  %v216_v8 = vrot.slane %v207_v6, %v2047_v20  ;;  %v568_v6 = vsub.s32 3, %v2038_v17 }
  0x47   :  { %1186 = vmatpush1.bf16.msra.mxu0 %v1658_v9 }
  0x48   :  { %1187 = vmatprep.subr.bf16.mxu0 %v1666_v10 }
  0x4b   :  { %1188 = vmatpush1.bf16.msra.mxu0 %v1664_v11 }
  0x4c   :  { %1189 = vmatprep.subr.bf16.mxu0 %v1672_v12 }
  0x4f   :  { %1190 = vmatpush1.bf16.msra.mxu0 %v1670_v13 }
  0x50   :  { %1191 = vmatprep.subr.bf16.mxu0 %v1678_v14 }
  0x53   :  { %1192 = vmatpush1.bf16.msra.mxu0 %v1676_v15 }
  0x54   :  { %1193 = vmatprep.subr.bf16.mxu0 %v1684_v60  ;;  %v1748_v60 = vld [vmem:[%s2345_s5 + $0x2b4] ss:$28 sps:$4 sm:$0xff]  }
  0x57   :  { %1194 = vmatpush1.bf16.msra.mxu0 %v1682_v62  ;;  %v1751_v62 = vld [vmem:[%s2345_s5 + $0x2ec] ss:$28 sps:$4 sm:$0xff]  }
  0x58   :  { %1195 = vmatprep.subr.bf16.mxu0 %v1690_v0  ;;  %v1754_v0 = vld [vmem:[%s2345_s5 + $0x324] ss:$28 sps:$4 sm:$0xff]  }
  0x5b   :  { %1196 = vmatpush1.bf16.msra.mxu0 %v1688_v2  ;;  %v1757_v2 = vld [vmem:[%s2345_s5 + $0x35c] ss:$28 sps:$4 sm:$0xff]  }
  0x5c   :  { %1247 = vmatprep.subr.bf16.mxu0 %v1696_v4  ;;  %v564_v4 = vsub.s32 2, %v2038_v17 }
  0xf1   :  { %v164_v23 = vpop.f32.mrb[0].mxu0 }
  0xf2   :  { %v165_v24 = vadd.f32 %v164_v23, %v47_v21  ;;  %v166_v25 = vpop.f32.mrb[1].mxu0  ;;  %v1694_v21 = vld [vmem:[%s2345_s5 + $0x10] ss:$28 sps:$4 sm:$0xff]  }
  0xf3   :  { %v167_v26 = vadd.f32 %v166_v25, %v51_v22  ;;  %v168_v27 = vpop.f32.mrb[2].mxu0  ;;  %v1698_v22 = vld [vmem:[%s2345_s5 + $0x18] ss:$28 sps:$4 sm:$0xff]   ;;  %v1702_v25 = vld [vmem:[%s2345_s5 + $0x210] ss:$28 sps:$4 sm:$0xff]  }
  0xf4   :  { %v171_v28 = vmax.f32 %v165_v24, 0.0  ;;  %v169_v29 = vpop.f32.mrb[3].mxu0  ;;  %v1701_v24 = vld [vmem:[%s2345_s5 + $0x4c] ss:$28 sps:$4 sm:$0xff]  }
  0xf5   :  { %v172_v30 = vmax.f32 %v167_v26, 0.0  ;;  %v1699_v26 = vld [vmem:[%s2345_s5 + $0x48] ss:$28 sps:$4 sm:$0xff]   ;;  %v1703_v27 = vld [vmem:[%s2345_s5 + $0x50] ss:$28 sps:$4 sm:$0xff]  }
  0xf6   :  { %v173_v33 = vpack.c.bf16 %v171_v28, %v171_v28  ;;  %v1706_v28 = vld [vmem:[%s2345_s5 + $0x84] ss:$28 sps:$4 sm:$0xff]  }
  0xf7   :  { %v174_v31 = vpack.c.bf16 %v172_v30, %v172_v30  ;;  %v1707_v29 = vld [vmem:[%s2345_s5 + $0x248] ss:$28 sps:$4 sm:$0xff]   ;;  %v1704_v30 = vld [vmem:[%s2345_s5 + $0x80] ss:$28 sps:$4 sm:$0xff]  }
  0xf9   :  { %411 = vmatprep.mubr.bf16.mxu1 %v174_v31  ;;  %v1708_v31 = vld [vmem:[%s2345_s5 + $0x88] ss:$28 sps:$4 sm:$0xff]  }
  0xfa   :  { %412 = vmatmul.mubr.bf16.vlgmr.msra.gmra.mrb[0].mxu1 %v173_v33  ;;  %v1712_v33 = vld [vmem:[%s2345_s5 + $0x280] ss:$28 sps:$4 sm:$0xff]  }
  0xfb   :  { %1207 = vmatpush1.bf16.msra.mxu1 %v1601_v32  ;;  %v1711_v32 = vld [vmem:[%s2345_s5 + $0xbc] ss:$28 sps:$4 sm:$0xff]  }
  0xfc   :  { %1208 = vmatprep.subr.bf16.mxu1 %v1609_v34  ;;  %v1709_v34 = vld [vmem:[%s2345_s5 + $0xb8] ss:$28 sps:$4 sm:$0xff]  }
  0xff   :  { %1209 = vmatpush1.bf16.msra.mxu1 %v1607_v35  ;;  %v1713_v35 = vld [vmem:[%s2345_s5 + $0xc0] ss:$28 sps:$4 sm:$0xff]  }
 0x100   :  { %1210 = vmatprep.subr.bf16.mxu1 %v1615_v36  ;;  %v1716_v36 = vld [vmem:[%s2345_s5 + $0xf4] ss:$28 sps:$4 sm:$0xff]  }
 0x103   :  { %1211 = vmatpush1.bf16.msra.mxu1 %v1613_v37  ;;  %v1717_v37 = vld [vmem:[%s2345_s5 + $0x2b8] ss:$28 sps:$4 sm:$0xff]  }
 0x104   :  { %1212 = vmatprep.subr.bf16.mxu1 %v1621_v38  ;;  %v1714_v38 = vld [vmem:[%s2345_s5 + $0xf0] ss:$28 sps:$4 sm:$0xff]  }
 0x107   :  { %1213 = vmatpush1.bf16.msra.mxu1 %v1619_v39  ;;  %v1718_v39 = vld [vmem:[%s2345_s5 + $0xf8] ss:$28 sps:$4 sm:$0xff]  }
 0x108   :  { %1214 = vmatprep.subr.bf16.mxu1 %v1627_v40  ;;  %v1721_v40 = vld [vmem:[%s2345_s5 + $0x12c] ss:$28 sps:$4 sm:$0xff]  }
 0x10b   :  { %1215 = vmatpush1.bf16.msra.mxu1 %v1625_v41  ;;  %v1722_v41 = vld [vmem:[%s2345_s5 + $0x2f0] ss:$28 sps:$4 sm:$0xff]  }
 0x10c   :  { %1216 = vmatprep.subr.bf16.mxu1 %v1633_v42  ;;  %v1719_v42 = vld [vmem:[%s2345_s5 + $0x128] ss:$28 sps:$4 sm:$0xff]  }
 0x10f   :  { %1217 = vmatpush1.bf16.msra.mxu1 %v1631_v43  ;;  %v1723_v43 = vld [vmem:[%s2345_s5 + $0x130] ss:$28 sps:$4 sm:$0xff]  }
 0x110   :  { %1218 = vmatprep.subr.bf16.mxu1 %v1639_v44  ;;  %v1726_v44 = vld [vmem:[%s2345_s5 + $0x164] ss:$28 sps:$4 sm:$0xff]  }
 0x113   :  { %1219 = vmatpush1.bf16.msra.mxu1 %v1637_v45  ;;  %v1727_v45 = vld [vmem:[%s2345_s5 + $0x328] ss:$28 sps:$4 sm:$0xff]  }
 0x114   :  { %1220 = vmatprep.subr.bf16.mxu1 %v1645_v46  ;;  %v1724_v46 = vld [vmem:[%s2345_s5 + $0x160] ss:$28 sps:$4 sm:$0xff]  }
 0x117   :  { %1221 = vmatpush1.bf16.msra.mxu1 %v1643_v47  ;;  %v1728_v47 = vld [vmem:[%s2345_s5 + $0x168] ss:$28 sps:$4 sm:$0xff]  }
 0x118   :  { %1222 = vmatprep.subr.bf16.mxu1 %v1651_v48  ;;  %v1731_v48 = vld [vmem:[%s2345_s5 + $0x19c] ss:$28 sps:$4 sm:$0xff]  }
 0x11b   :  { %1223 = vmatpush1.bf16.msra.mxu1 %v1649_v49  ;;  %v1732_v49 = vld [vmem:[%s2345_s5 + $0x360] ss:$28 sps:$4 sm:$0xff]  }
 0x11c   :  { %1224 = vmatprep.subr.bf16.mxu1 %v1657_v50  ;;  %v1729_v50 = vld [vmem:[%s2345_s5 + $0x198] ss:$28 sps:$4 sm:$0xff]  }
 0x11f   :  { %1225 = vmatpush1.bf16.msra.mxu1 %v1655_v51  ;;  %v1733_v51 = vld [vmem:[%s2345_s5 + $0x1a0] ss:$28 sps:$4 sm:$0xff]  }
 0x120   :  { %1226 = vmatprep.subr.bf16.mxu1 %v1663_v52  ;;  %v1736_v52 = vld [vmem:[%s2345_s5 + $0x1d4] ss:$28 sps:$4 sm:$0xff]  }
 0x123   :  { %1227 = vmatpush1.bf16.msra.mxu1 %v1661_v53  ;;  %v1734_v53 = vld [vmem:[%s2345_s5 + $0x1d0] ss:$28 sps:$4 sm:$0xff]  }
 0x124   :  { %1228 = vmatprep.subr.bf16.mxu1 %v1669_v54  ;;  %v1739_v54 = vld [vmem:[%s2345_s5 + $0x20c] ss:$28 sps:$4 sm:$0xff]  }
 0x127   :  { %1229 = vmatpush1.bf16.msra.mxu1 %v1667_v55  ;;  %v1737_v55 = vld [vmem:[%s2345_s5 + $0x208] ss:$28 sps:$4 sm:$0xff]  }
 0x128   :  { %1230 = vmatprep.subr.bf16.mxu1 %v1675_v56  ;;  %v1742_v56 = vld [vmem:[%s2345_s5 + $0x244] ss:$28 sps:$4 sm:$0xff]  }
 0x12b   :  { %1231 = vmatpush1.bf16.msra.mxu1 %v1673_v57  ;;  %v1740_v57 = vld [vmem:[%s2345_s5 + $0x240] ss:$28 sps:$4 sm:$0xff]  }
 0x12c   :  { %1232 = vmatprep.subr.bf16.mxu1 %v1681_v58  ;;  %v1745_v58 = vld [vmem:[%s2345_s5 + $0x27c] ss:$28 sps:$4 sm:$0xff]  }
 0x12f   :  { %1233 = vmatpush1.bf16.msra.mxu1 %v1679_v59  ;;  %v1743_v59 = vld [vmem:[%s2345_s5 + $0x278] ss:$28 sps:$4 sm:$0xff]  }
 0x130   :  { %1234 = vmatprep.subr.bf16.mxu1 %v1687_v61  ;;  %v1746_v61 = vld [vmem:[%s2345_s5 + $0x2b0] ss:$28 sps:$4 sm:$0xff]  }
 0x133   :  { %1235 = vmatpush1.bf16.msra.mxu1 %v1685_v63  ;;  %v1749_v63 = vld [vmem:[%s2345_s5 + $0x2e8] ss:$28 sps:$4 sm:$0xff]  }
 0x134   :  { %1236 = vmatprep.subr.bf16.mxu1 %v1693_v1  ;;  %v1752_v1 = vld [vmem:[%s2345_s5 + $0x320] ss:$28 sps:$4 sm:$0xff]  }
 0x137   :  { %1237 = vmatpush1.bf16.msra.mxu1 %v1691_v3  ;;  %v1755_v3 = vld [vmem:[%s2345_s5 + $0x358] ss:$28 sps:$4 sm:$0xff]  }
 0x138   :  { %1507 = vmatprep.subr.bf16.mxu1 %v1697_v5  ;;  %v552_v5 = vld [vmem:[%s2348_s6] sm:$0x7f] }
 0x1cd   :  { %v413_v9 = vpop.f32.mrb[0].mxu1 }
 0x1ce   :  { %v414_v10 = vadd.f32 %v413_v9, %v212_v7  ;;  %v415_v11 = vpop.f32.mrb[1].mxu1  ;;  %v557_v7 = vrot.slane %v552_v5, %v2041_v18  ;;  %v561_v9 = vrot.slane %v552_v5, %v2047_v20 }
 0x1cf   :  { %v416_v12 = vadd.f32 %v415_v11, %v216_v8  ;;  %v417_v13 = vpop.f32.mrb[2].mxu1  ;;  %v565_v8 = vrot.slane %v552_v5, %v564_v4 }
 0x1d0   :  { %v420_v14 = vmax.f32 %v414_v10, 0.0  ;;  %v418_v15 = vpop.f32.mrb[3].mxu1  ;;  %v569_v10 = vrot.slane %v552_v5, %v568_v6 }
 0x1d1   :  { %v421_v16 = vmax.f32 %v416_v12, 0.0 }
 0x1d2   :  { %v2173_v23 = vpack.c.bf16 %v420_v14, %v420_v14 }
 0x1d3   :  { %v423_v19 = vpack.c.bf16 %v421_v16, %v421_v16 }
 0x1d5   :  { %1197 = vmatprep.mubr.bf16.mxu0 %v423_v19  ;;  %1238 = vmatprep.mubr.bf16.mxu1 %v423_v19 }
 0x1d6   :  { %1198 = vmatmul.mubr.bf16.vlgmr.msra.gmra.mrb[4].mxu0 %v2173_v23  ;;  %1239 = vmatmul.mubr.bf16.vlgmr.msra.gmra.mrb[4].mxu1 %v2173_v23 }
 0x1d7   :  { %1248 = vmatpush1.bf16.msra.mxu0 %v1694_v21  ;;  %1508 = vmatpush3.bf16.msra.mxu1 %v1698_v22 }
 0x1d8   :  { %1279 = vmatprep.mubr.bf16.mxu0 %v423_v19  ;;  %1320 = vmatprep.mubr.bf16.mxu1 %v423_v19 }
 0x1d9   :  { %1249 = vmatprep.subr.bf16.mxu0 %v1701_v24  ;;  %1509 = vmatprep.subr.bf16.mxu1 %v1702_v25 }
 0x1db   :  { %1250 = vmatpush1.bf16.msra.mxu0 %v1699_v26  ;;  %1510 = vmatpush3.bf16.msra.mxu1 %v1703_v27 }
 0x1dc   :  { %1251 = vmatprep.subr.bf16.mxu0 %v1706_v28  ;;  %1511 = vmatprep.subr.bf16.mxu1 %v1707_v29  ;;  %v580_v28 = vsub.s32 6, %v2038_v17 }
 0x1df   :  { %1252 = vmatpush1.bf16.msra.mxu0 %v1704_v30  ;;  %1512 = vmatpush3.bf16.msra.mxu1 %v1708_v31  ;;  %v581_v30 = vrot.slane %v552_v5, %v580_v28 }
 0x1e0   :  { %1253 = vmatprep.subr.bf16.mxu0 %v1711_v32  ;;  %1513 = vmatprep.subr.bf16.mxu1 %v1712_v33 }
 0x1e3   :  { %1254 = vmatpush1.bf16.msra.mxu0 %v1709_v34  ;;  %1514 = vmatpush3.bf16.msra.mxu1 %v1713_v35 }
 0x1e4   :  { %1255 = vmatprep.subr.bf16.mxu0 %v1716_v36  ;;  %1515 = vmatprep.subr.bf16.mxu1 %v1717_v37  ;;  %v572_v37 = vsub.s32 4, %v2038_v17 }
 0x1e7   :  { %1256 = vmatpush1.bf16.msra.mxu0 %v1714_v38  ;;  %1516 = vmatpush3.bf16.msra.mxu1 %v1718_v39  ;;  %v576_v38 = vsub.s32 5, %v2038_v17  ;;  %v573_v39 = vrot.slane %v552_v5, %v572_v37 }
 0x1e8   :  { %1257 = vmatprep.subr.bf16.mxu0 %v1721_v40  ;;  %1517 = vmatprep.subr.bf16.mxu1 %v1722_v41 }
 0x1e9   :  { %v577_v40 = vrot.slane %v552_v5, %v576_v38 }
 0x1eb   :  { %1258 = vmatpush1.bf16.msra.mxu0 %v1719_v42  ;;  %1518 = vmatpush3.bf16.msra.mxu1 %v1723_v43 }
 0x1ec   :  { %1259 = vmatprep.subr.bf16.mxu0 %v1726_v44  ;;  %1519 = vmatprep.subr.bf16.mxu1 %v1727_v45 }
 0x1ef   :  { %1260 = vmatpush1.bf16.msra.mxu0 %v1724_v46  ;;  %1520 = vmatpush3.bf16.msra.mxu1 %v1728_v47 }
 0x1f0   :  { %1261 = vmatprep.subr.bf16.mxu0 %v1731_v48  ;;  %1521 = vmatprep.subr.bf16.mxu1 %v1732_v49 }
 0x1f3   :  { %1262 = vmatpush1.bf16.msra.mxu0 %v1729_v50  ;;  %1522 = vmatpush3.bf16.msra.mxu1 %v1733_v51 }
 0x1f4   :  { %1263 = vmatprep.subr.bf16.mxu0 %v1736_v52 }
 0x1f6   :  { %1321 = vmatmul.mubr.bf16.vlgmr.msra.gmra.mrb[8].mxu1 %v2173_v23 }
 0x1f7   :  { %1264 = vmatpush1.bf16.msra.mxu0 %v1734_v53 }
 0x1f8   :  { %1265 = vmatprep.subr.bf16.mxu0 %v1739_v54 }
 0x1fb   :  { %1266 = vmatpush1.bf16.msra.mxu0 %v1737_v55 }
 0x1fc   :  { %1267 = vmatprep.subr.bf16.mxu0 %v1742_v56 }
 0x1ff   :  { %1268 = vmatpush1.bf16.msra.mxu0 %v1740_v57 }
 0x200   :  { %1269 = vmatprep.subr.bf16.mxu0 %v1745_v58 }
 0x203   :  { %1270 = vmatpush1.bf16.msra.mxu0 %v1743_v59 }
 0x204   :  { %1271 = vmatprep.subr.bf16.mxu0 %v1748_v60 }
 0x207   :  { %1272 = vmatpush1.bf16.msra.mxu0 %v1746_v61 }
 0x208   :  { %1273 = vmatprep.subr.bf16.mxu0 %v1751_v62 }
 0x20b   :  { %1274 = vmatpush1.bf16.msra.mxu0 %v1749_v63 }
 0x20c   :  { %1275 = vmatprep.subr.bf16.mxu0 %v1754_v0 }
 0x20f   :  { %1276 = vmatpush1.bf16.msra.mxu0 %v1752_v1 }
 0x210   :  { %1277 = vmatprep.subr.bf16.mxu0 %v1757_v2 }
 0x213   :  { %1278 = vmatpush1.bf16.msra.mxu0 %v1755_v3 }
 0x216   :  { %1280 = vmatmul.mubr.bf16.vlgmr.msra.gmra.mrb[8].mxu0 %v2173_v23 }
 0x2a9   :  { %v1199_v11 = vpop.f32.mrb[4].mxu0  ;;  %v1240_v12 = vpop.f32.mrb[4].mxu1 }
 0x2aa   :  { %v1200_v13 = vadd.f32 %v1199_v11, %v557_v7  ;;  %v1241_v14 = vadd.f32 %v1240_v12, %v565_v8  ;;  %v1201_v15 = vpop.f32.mrb[5].mxu0  ;;  %v1242_v16 = vpop.f32.mrb[5].mxu1 }
 0x2ab   :  { %v1202_v19 = vadd.f32 %v1201_v15, %v561_v9  ;;  %v1243_v21 = vadd.f32 %v1242_v16, %v569_v10  ;;  %v1203_v22 = vpop.f32.mrb[6].mxu0  ;;  %v1244_v23 = vpop.f32.mrb[6].mxu1 }
 0x2ac   :  { %1758 = vtanh.f32 %v1200_v13  ;;  %v1204_v24 = vpop.f32.mrb[7].mxu0  ;;  %v1245_v25 = vpop.f32.mrb[7].mxu1 }
 0x2ad   :  { %1760 = vtanh.f32 %v1241_v14 }
 0x2ae   :  { %1762 = vtanh.f32 %v1202_v19 }
 0x2af   :  { %1764 = vtanh.f32 %v1243_v21 }
 0x2b6   :  { %v1759_v18 = vpop.eup %1758 }
 0x2b7   :  { %v1761_v26 = vpop.eup %1760  ;;  %1335 = vst [vmem:[%s2349_s7] sm:$0xff] %v1759_v18 }
 0x2b8   :  { %v1763_v20 = vpop.eup %1762  ;;  %1337 = vst [vmem:[%s2349_s7 + $0x10] sm:$0xff] %v1761_v26 }
 0x2b9   :  { %v1765_v27 = vpop.eup %1764  ;;  %1336 = vst [vmem:[%s2349_s7 + $0x8] sm:$0xff] %v1763_v20 }
 0x2ba   :  { %1338 = vst [vmem:[%s2349_s7 + $0x18] sm:$0xff] %v1765_v27 }
 0x2c9   :  { %v1523_v29 = vpop.f32.mrb[8].mxu1 }
 0x2ca   :  { %v1524_v31 = vpop.f32.mrb[9].mxu1 }
 0x2cb   :  { %v1525_v32 = vadd.f32 %v1524_v31, %v1523_v29  ;;  %v1526_v33 = vpop.f32.mrb[10].mxu1 }
 0x2cc   :  { %v1527_v34 = vpop.f32.mrb[11].mxu1 }
 0x2cd   :  { %v1323_v35 = vadd.f32 %v1525_v32, %v581_v30 }
 0x2cf   :  { %1766 = vtanh.f32 %v1323_v35 }
 0x2d9   :  { %v1767_v36 = vpop.eup %1766 }
 0x2da   :  { %1342 = vst.msk [vmem:[%s2349_s7 + $0x30] sm:$0xff] %vm1341_vm2, %v1767_v36 }
 0x2e9   :  { %v1281_v41 = vpop.f32.mrb[8].mxu0 }
 0x2ea   :  { %v1282_v42 = vadd.f32 %v1281_v41, %v573_v39  ;;  %v1283_v43 = vpop.f32.mrb[9].mxu0 }
 0x2eb   :  { %v1284_v44 = vadd.f32 %v1283_v43, %v577_v40  ;;  %v1285_v45 = vpop.f32.mrb[10].mxu0 }
 0x2ec   :  { %1768 = vtanh.f32 %v1282_v42  ;;  %v1286_v46 = vpop.f32.mrb[11].mxu0 }
 0x2ed   :  { %1770 = vtanh.f32 %v1284_v44 }
 0x2f6   :  { %v1769_v47 = vpop.eup %1768 }
 0x2f7   :  { %v1771_v48 = vpop.eup %1770  ;;  %1339 = vst [vmem:[%s2349_s7 + $0x20] sm:$0xff] %v1769_v47 }
 0x2f8   :  { %1340 = vst [vmem:[%s2349_s7 + $0x28] sm:$0xff] %v1771_v48 }

</bundles_post_ra>
